<compile_context>
chip_gen: v7x
topology: tpu7x:2x2x1
jax: 0.10.0
libtpu: 0.0.40
codegen_flags: <defaults>
</compile_context>

<pallas_src>
import functools

import jax
import jax.numpy as jnp
from jax import lax
from jax.experimental import pallas as pl
from jax.experimental.pallas import tpu as pltpu


def _round_up(x, m):
    return ((x + m - 1) // m) * m


def _round_down(x, m):
    return max(m, (x // m) * m)


def _body(mean_l_ref, mean_r_ref, x_l_ref, x_r_ref, out_ref, acc_ref, *,
          n_rows, tile_n, tile_d, mask_rows, compute_dtype):
    j = pl.program_id(0)        # Gram column block  (parallel axis)
    i = pl.program_id(1)        # batch tile         (reduction, arbitrary)

    @pl.when(i == 0)
    def _init():
        acc_ref[...] = jnp.zeros_like(acc_ref)

    # Center in f32 on the VPU; padded (out-of-range) rows of the ragged last
    # tile are zeroed so they contribute nothing to the Gram accumulation.
    z_l = x_l_ref[...].astype(jnp.float32) - mean_l_ref[...]     # [tile_n, D]
    if x_r_ref is x_l_ref:
        z_r = z_l                                                # monolithic path
    else:
        z_r = x_r_ref[...].astype(jnp.float32) - mean_r_ref[...]  # [tile_n, tile_d]

    if mask_rows:
        rows_left = n_rows - i * tile_n
        row_id = lax.broadcasted_iota(jnp.int32, (tile_n, 1), 0)
        valid = row_id < rows_left
        z_l = jnp.where(valid, z_l, 0.0)
        z_r = z_l if x_r_ref is x_l_ref else jnp.where(valid, z_r, 0.0)

    # Gram column block: acc[D, tile_d] += Z^T @ Z[:, j-block]  (MXU, f32 acc).
    acc_ref[...] += lax.dot_general(
        z_l.astype(compute_dtype), z_r.astype(compute_dtype),
        dimension_numbers=(((0,), (0,)), ((), ())),
        preferred_element_type=jnp.float32,
    )

    @pl.when(i == pl.num_programs(1) - 1)
    def _finalize():
        g = acc_ref[...]                                          # [D, tile_d]
        rows = lax.broadcasted_iota(jnp.int32, g.shape, 0)
        cols = lax.broadcasted_iota(jnp.int32, g.shape, 1)
        off = jnp.where(rows == cols + j * tile_d, 0.0, g)        # zero diagonal
        partial = jnp.sum(off * off)
        # Lane-aligned (8, 128) output block; the partial sits at [0, 0] and
        # everything else is zero so the wrapper can simply jnp.sum().
        r8 = lax.broadcasted_iota(jnp.int32, (8, 128), 0)
        c128 = lax.broadcasted_iota(jnp.int32, (8, 128), 1)
        out_ref[...] = jnp.where((r8 == 0) & (c128 == 0), partial, 0.0)


def _kernel_mono(mean_ref, x_ref, out_ref, acc_ref, **kw):
    _body(mean_ref, mean_ref, x_ref, x_ref, out_ref, acc_ref, **kw)


def _kernel_tiled(mean_l_ref, mean_r_ref, x_l_ref, x_r_ref, out_ref, acc_ref, **kw):
    _body(mean_l_ref, mean_r_ref, x_l_ref, x_r_ref, out_ref, acc_ref, **kw)


def correlation_penalty_loss(x, *, tile_n=None, tile_d=None, use_bf16_matmul=False):
    """x: [N, D] array (float32 or bfloat16). Returns scalar float32 loss."""
    n, d = x.shape
    itemsize = jnp.dtype(x.dtype).itemsize
    gran = max(8, 32 // itemsize)          # sublane granularity: 8 f32 / 16 bf16 / 32 int8

    # ---- Gram column-block size (tile_d) ------------------------------------
    if tile_d is None:
        if d * d * 4 <= 16 * 1024 * 1024 or d % 128 != 0:
            # Monolithic [D, D] accumulator (<= 16 MiB) -> X is read once.
            # TODO(synk): very large D not divisible by 128 still falls back to
            # the monolithic accumulator and may exceed VMEM.
            tile_d = d
        else:
            tile_d = next(c for c in (512, 256, 128) if d % c == 0)
    else:
        tile_d = int(tile_d)
        if tile_d != d and (d % tile_d != 0 or tile_d % 128 != 0):
            raise ValueError("tile_d must equal D or be a multiple of 128 dividing D")
    tiled = tile_d != d
    num_db = d // tile_d

    # ---- batch tile size (tile_n): fill a ~40 MiB VMEM budget ----------------
    budget = 40 * 1024 * 1024
    acc_bytes = d * tile_d * 4
    per_row = 2 * d * itemsize + (2 * tile_d * itemsize if tiled else 0)
    if tile_n is None:
        avail = max(budget - acc_bytes, 2 * 1024 * 1024)
        tile_n = int(min(2048, max(gran, avail // per_row)))
        tile_n = _round_down(tile_n, gran)
    else:
        tile_n = _round_up(int(tile_n), gran)
    tile_n = max(gran, min(tile_n, _round_up(n, gran)))
    num_nb = pl.cdiv(n, tile_n)
    mask_rows = (n % tile_n) != 0          # only generate mask code when needed

    # ---- first (cheap) pass: column mean in f32 (fixes cancellation risk) ----
    mean = jnp.mean(x.astype(jnp.float32), axis=0, keepdims=True)   # [1, D] f32

    # bf16 MXU fast path for bf16 inputs (or when explicitly requested).
    if use_bf16_matmul or x.dtype == jnp.bfloat16:
        compute_dtype = jnp.bfloat16
    else:
        compute_dtype = jnp.float32

    kw = dict(n_rows=n, tile_n=tile_n, tile_d=tile_d,
              mask_rows=mask_rows, compute_dtype=compute_dtype)

    # ---- VMEM accounting & compiler params -----------------------------------
    vmem_needed = (acc_bytes
                   + 2 * tile_n * d * itemsize
                   + (2 * tile_n * tile_d * itemsize if tiled else 0)
                   + 4 * d * 4 + (1 << 20))
    vmem_limit = int(min(max(vmem_needed + (4 << 20), 32 << 20), 96 << 20))

    cparams = pltpu.CompilerParams(
        dimension_semantics=("parallel", "arbitrary"),
        vmem_limit_bytes=vmem_limit,
    )
    cost = pl.CostEstimate(
        flops=2 * n * d * d + 2 * n * d,
        transcendentals=0,
        bytes_accessed=(num_db * n * d + (n * d if tiled else 0)) * itemsize
                       + d * 4 + num_db * 8 * 128 * 4,
    )

    grid = (num_db, num_nb)
    out_shape = jax.ShapeDtypeStruct((8 * num_db, 128), jnp.float32)
    out_spec = pl.BlockSpec((8, 128), lambda jb, ib: (jb, 0))
    scratch = [pltpu.VMEM((d, tile_d), jnp.float32)]     # resident Gram acc

    if not tiled:
        kernel = functools.partial(_kernel_mono, **kw)
        in_specs = [
            pl.BlockSpec((1, d), lambda jb, ib: (0, 0)),          # mean
            pl.BlockSpec((tile_n, d), lambda jb, ib: (ib, 0)),    # X batch tile
        ]
        args = (mean, x)
    else:
        kernel = functools.partial(_kernel_tiled, **kw)
        in_specs = [
            pl.BlockSpec((1, d), lambda jb, ib: (0, 0)),               # mean (full)
            pl.BlockSpec((1, tile_d), lambda jb, ib: (0, jb)),         # mean column blk
            pl.BlockSpec((tile_n, d), lambda jb, ib: (ib, 0)),         # X batch tile
            pl.BlockSpec((tile_n, tile_d), lambda jb, ib: (ib, jb)),   # X column blk
        ]
        args = (mean, mean, x, x)

    out = pl.pallas_call(
        kernel,
        out_shape=out_shape,
        grid_spec=pltpu.PrefetchScalarGridSpec(
            num_scalar_prefetch=0,
            grid=grid,
            in_specs=in_specs,
            out_specs=out_spec,
            scratch_shapes=scratch,
        ),
        compiler_params=cparams,
        cost_estimate=cost,
    )(*args)

    return jnp.sqrt(jnp.sum(out)) / n


def _reference(x):
    x = x.astype(jnp.float32)
    mean1 = jnp.mean(x, axis=0)
    zeroed = x - mean1
    cor_mat = zeroed.T @ zeroed
    no_diag = cor_mat - jnp.diag(jnp.diag(cor_mat))
    return jnp.sqrt(jnp.sum(no_diag * no_diag)) / x.shape[0]


if __name__ == "__main__":
    key = jax.random.PRNGKey(0)
    k1, k2, k3 = jax.random.split(key, 3)

    # 1) Ragged batch + multi-step reduction grid (monolithic Gram, D=32):
    #    grid = (1, 4), in-kernel row mask on every step (100 % 32 != 0).
    x1 = jax.random.normal(k1, (100, 32), dtype=jnp.float32)
    loss1 = correlation_penalty_loss(x1, tile_n=32)
    jax.block_until_ready(loss1)
    ref1 = _reference(x1)
    assert jnp.allclose(loss1, ref1, rtol=1e-4, atol=1e-4), (loss1, ref1)

    # 2) Column-tiled Gram accumulator: grid = (2, 3), exercises the parallel
    #    d-block axis, per-block diagonal offset, and per-block partial outputs.
    x2 = jax.random.normal(k2, (192, 256), dtype=jnp.float32)
    loss2 = correlation_penalty_loss(x2, tile_n=64, tile_d=128)
    jax.block_until_ready(loss2)
    ref2 = _reference(x2)
    assert jnp.allclose(loss2, ref2, rtol=1e-4, atol=1e-4), (loss2, ref2)

    # 3) Fully automatic tile selection (monolithic, single grid step).
    x3 = jax.random.normal(k3, (384, 128), dtype=jnp.float32)
    loss3 = correlation_penalty_loss(x3)
    jax.block_until_ready(loss3)
    ref3 = _reference(x3)
    assert jnp.allclose(loss3, ref3, rtol=1e-4, atol=1e-4), (loss3, ref3)

    # 4) bf16 input -> bf16 MXU fast path with f32 accumulation.
    x4 = x2.astype(jnp.bfloat16)
    loss4 = correlation_penalty_loss(x4, tile_n=64, tile_d=128)
    jax.block_until_ready(loss4)
    ref4 = _reference(x4)
    assert jnp.allclose(loss4, ref4, rtol=3e-2, atol=3e-2), (loss4, ref4)

    print("KERNEL_OK")
</pallas_src>

<mosaic_0001>
module attributes {stable_mosaic.version = 11 : i64} {
  func.func @_kernel_mono(%arg0: i32, %arg1: i32, %arg2: memref<1x32xf32, #tpu.memory_space<vmem>>, %arg3: memref<32x32xf32, #tpu.memory_space<vmem>>, %arg4: memref<8x128xf32, #tpu.memory_space<vmem>>, %arg5: memref<32x32xf32, #tpu.memory_space<vmem>>) attributes {dimension_semantics = [#tpu.dimension_semantics<parallel>, #tpu.dimension_semantics<arbitrary>], iteration_bounds = array<i64: 1, 4>, scalar_prefetch = 0 : i64, scratch_operands = 1 : i64, tpu.core_type = #tpu.core_type<tc>, window_params = [{pipeline_mode = #tpu.pipeline_mode<synchronous>, transform_indices = @transform_0, window_bounds = array<i64: 1, 32>}, {transform_indices = @transform_1, window_bounds = array<i64: 32, 32>}, {transform_indices = @transform_2, window_bounds = array<i64: 8, 128>}]} {
    %c0_i32 = arith.constant 0 : i32
    %0 = arith.cmpi eq, %arg1, %c0_i32 : i32
    %1 = arith.extui %0 : i1 to i32
    %c0_i32_0 = arith.constant 0 : i32
    %2 = arith.cmpi ne, %1, %c0_i32_0 : i32
    scf.if %2 {
      %cst_10 = arith.constant 0.000000e+00 : f32
      %23 = vector.broadcast %cst_10 : f32 to vector<32x32xf32>
      %c0_11 = arith.constant 0 : index
      %c0_12 = arith.constant 0 : index
      %24 = vector.load %arg5[%c0_11, %c0_12] : memref<32x32xf32, #tpu.memory_space<vmem>>, vector<32x32xf32>
      tpu.vector_store %arg5[%c0_11, %c0_12], %23 {strides = array<i32>} : memref<32x32xf32, #tpu.memory_space<vmem>>, vector<32x32xf32>,
    } else {
    }
    %c0 = arith.constant 0 : index
    %c0_1 = arith.constant 0 : index
    %3 = vector.load %arg3[%c0, %c0_1] : memref<32x32xf32, #tpu.memory_space<vmem>>, vector<32x32xf32>
    %c0_2 = arith.constant 0 : index
    %c0_3 = arith.constant 0 : index
    %4 = vector.load %arg2[%c0_2, %c0_3] : memref<1x32xf32, #tpu.memory_space<vmem>>, vector<1x32xf32>
    %5 = vector.broadcast %4 : vector<1x32xf32> to vector<32x32xf32>
    %6 = arith.subf %3, %5 : vector<32x32xf32>
    %c32_i32 = arith.constant 32 : i32
    %7 = arith.muli %arg1, %c32_i32 : i32
    %c100_i32 = arith.constant 100 : i32
    %8 = arith.subi %c100_i32, %7 : i32
    %9 = tpu.iota {dimensions = array<i32: 0>} : vector<32x1xi32>
    %10 = vector.broadcast %8 : i32 to vector<32x1xi32>
    %11 = arith.cmpi slt, %9, %10 : vector<32x1xi32>
    %cst = arith.constant 0.000000e+00 : f32
    %12 = vector.shape_cast %11 : vector<32x1xi1> to vector<32x1xi1>
    %13 = vector.broadcast %12 : vector<32x1xi1> to vector<32x32xi1>
    %14 = vector.broadcast %cst : f32 to vector<32x32xf32>
    %15 = arith.select %13, %6, %14 : vector<32x32xi1>, vector<32x32xf32>
    %c0_4 = arith.constant 0 : index
    %c0_5 = arith.constant 0 : index
    %16 = vector.load %arg5[%c0_4, %c0_5] : memref<32x32xf32, #tpu.memory_space<vmem>>, vector<32x32xf32>
    %cst_6 = arith.constant dense<0.000000e+00> : vector<32x32xf32>
    %17 = tpu.matmul %15, %15, %cst_6 {dimension_numbers = #tpu.dot_dimension_numbers<[0], [0], [1], [1], [0, 1, 1, 1], [], []>} : vector<32x32xf32>, vector<32x32xf32>, vector<32x32xf32> -> vector<32x32xf32>
    %18 = arith.addf %16, %17 : vector<32x32xf32>
    %c0_7 = arith.constant 0 : index
    %c0_8 = arith.constant 0 : index
    %19 = vector.load %arg5[%c0_7, %c0_8] : memref<32x32xf32, #tpu.memory_space<vmem>>, vector<32x32xf32>
    tpu.vector_store %arg5[%c0_7, %c0_8], %18 {strides = array<i32>} : memref<32x32xf32, #tpu.memory_space<vmem>>, vector<32x32xf32>,
    %c3_i32 = arith.constant 3 : i32
    %20 = arith.cmpi eq, %arg1, %c3_i32 : i32
    %21 = arith.extui %20 : i1 to i32
    %c0_i32_9 = arith.constant 0 : i32
    %22 = arith.cmpi ne, %21, %c0_i32_9 : i32
    scf.if %22 {
      %c0_10 = arith.constant 0 : index
      %c0_11 = arith.constant 0 : index
      %23 = vector.load %arg5[%c0_10, %c0_11] : memref<32x32xf32, #tpu.memory_space<vmem>>, vector<32x32xf32>
      %24 = tpu.iota {dimensions = array<i32: 0>} : vector<32x32xi32>
      %25 = tpu.iota {dimensions = array<i32: 1>} : vector<32x32xi32>
      %c32_i32_12 = arith.constant 32 : i32
      %26 = arith.muli %arg0, %c32_i32_12 : i32
      %27 = vector.broadcast %26 : i32 to vector<32x32xi32>
      %28 = arith.addi %25, %27 : vector<32x32xi32>
      %29 = arith.cmpi eq, %24, %28 : vector<32x32xi32>
      %cst_13 = arith.constant 0.000000e+00 : f32
      %30 = vector.broadcast %cst_13 : f32 to vector<32x32xf32>
      %31 = arith.select %29, %30, %23 : vector<32x32xi1>, vector<32x32xf32>
      %32 = arith.mulf %31, %31 : vector<32x32xf32>
      %33 = vector.shape_cast %32 : vector<32x32xf32> to vector<1x32x32xf32>
      %cst_14 = arith.constant dense<0.000000e+00> : vector<1xf32>
      %34 = vector.multi_reduction <add>, %33, %cst_14 [1, 2] : vector<1x32x32xf32> to vector<1xf32>
      %35 = vector.shape_cast %34 : vector<1xf32> to vector<1x1x1xf32>
      %36 = vector.extract %35[0, 0, 0] : f32 from vector<1x1x1xf32>
      %37 = tpu.iota {dimensions = array<i32: 0>} : vector<8x128xi32>
      %38 = tpu.iota {dimensions = array<i32: 1>} : vector<8x128xi32>
      %c0_i32_15 = arith.constant 0 : i32
      %39 = vector.broadcast %c0_i32_15 : i32 to vector<8x128xi32>
      %40 = arith.cmpi eq, %37, %39 : vector<8x128xi32>
      %c0_i32_16 = arith.constant 0 : i32
      %41 = vector.broadcast %c0_i32_16 : i32 to vector<8x128xi32>
      %42 = arith.cmpi eq, %38, %41 : vector<8x128xi32>
      %43 = arith.andi %40, %42 : vector<8x128xi1>
      %cst_17 = arith.constant 0.000000e+00 : f32
      %44 = vector.broadcast %36 : f32 to vector<8x128xf32>
      %45 = vector.broadcast %cst_17 : f32 to vector<8x128xf32>
      %46 = arith.select %43, %44, %45 : vector<8x128xi1>, vector<8x128xf32>
      %c0_18 = arith.constant 0 : index
      %c0_19 = arith.constant 0 : index
      %47 = vector.load %arg4[%c0_18, %c0_19] : memref<8x128xf32, #tpu.memory_space<vmem>>, vector<8x128xf32>
      tpu.vector_store %arg4[%c0_18, %c0_19], %46 {strides = array<i32>} : memref<8x128xf32, #tpu.memory_space<vmem>>, vector<8x128xf32>,
    } else {
    }
    return
  }
  func.func @transform_0(%arg0: i32, %arg1: i32) -> (i32, i32) {
    %c0_i32 = arith.constant 0 : i32
    %c0_i32_0 = arith.constant 0 : i32
    %c0_i32_1 = arith.constant 0 : i32
    return %c0_i32, %c0_i32_0 : i32, i32
  }
  func.func @transform_1(%arg0: i32, %arg1: i32) -> (i32, i32) {
    %c0_i32 = arith.constant 0 : i32
    %c0_i32_0 = arith.constant 0 : i32
    return %arg1, %c0_i32 : i32, i32
  }
  func.func @transform_2(%arg0: i32, %arg1: i32) -> (i32, i32) {
    %c0_i32 = arith.constant 0 : i32
    %c0_i32_0 = arith.constant 0 : i32
    return %arg0, %c0_i32 : i32, i32
  }
}

</mosaic_0001>

<bundles_post_ra>
// kernel: tpu_custom_call.1
= control target key start
LH: loop header
LB: loop body
LE: loop exit
PB: predicated region body
PF: predicated region fallthrough
CT: control target
= control target key end

     0   :  { %7 = vsyncpa [#allocation4], 0  ;;  %s631_s9 = smov 0   ;;  %s633_s10 = smov 0   ;;  %s733_s0 = inlined_call_operand.vmem [shape: f32[1,32], index: 0, kind: input, shape index: {}]   ;;  %s734_s1 = inlined_call_operand.vmem [shape: f32[100,32], index: 1, kind: input, shape index: {}]   ;;  %s735_s2 = inlined_call_operand.hbm [shape: f32[8,128], index: 2, kind: output, shape index: {}]  }
   0x1   :  { %s635_s11 = smov 0  }
   0x2 LB: > { %s465_s12 = sadd.s32 4294967295, %s612_s11   ;;  %s22_s13 = sadd.s32 1, %s608_s10  ;;  %s612_s11 = sphi %s635_s11, %s13_s11   ;;  %s608_s10 = sphi %s633_s10, %s738_s10   ;;  %s604_s9 = sphi %s631_s9, %s737_s9  }
   0x3   : > { %p23_p0 = scmp.ge.s32.totalorder %s22_s13, 4  ;;  %p468_p1 = scmp.ge.s32.totalorder %s612_s11, 1 }
   0x4   : > { %p134_p2 = scmp.lt.s32.totalorder %s612_s11, 5 }
   0x5   : > { %s740_s13 = smov (%p23_p0, %s22_s13), 0 }
   0x6   : > { %p135_p3 = pnand %p468_p1, %p134_p2 }
   0x7   : > { %s469_s14 = sshll.u32 (!%p135_p3), %s604_s9, 2  ;;  %p471_p5 = scmp.ne.s32.totalorder (!%p135_p3), %s604_s9, 0 }
   0x8   : > { %138 = sbr.rel (%p135_p3) target bundleno = 632 (0x278), region = 28  ;;  %p160_p4 = scmp.lt.s32.totalorder (!%p135_p3), %s469_s14, 12 }
   0xf   : > { %s742_s14 = smov (!%p160_p4, %s469_s14), 12  ;;  %172 = sbr.rel (%p471_p5) target bundleno = 22 (0x16), region = 32 }
  0x10   : > { %s470_s15 = sshll.u32 %s742_s14, 3  ;;  %vm173_vm0 = vcmask (!%p471_p5), 261120   ;;  %v614_v0 = vmov (!%p471_p5), 0.0  }
  0x11   : > { %s163_s18 = scalar_lea.vmem %s734_s1, %s470_s15  ;;  %174 = vst.msk [vmem:[#allocation2] sm:$0xff] (!%p471_p5), %vm173_vm0, %v614_v0  ;;  %175 = vst.msk [vmem:[#allocation2 + $0x8] sm:$0xff] (!%p471_p5), %vm173_vm0, %v614_v0 }
  0x12   : > { %176 = vst.msk [vmem:[#allocation2 + $0x10] sm:$0xff] (!%p471_p5), %vm173_vm0, %v614_v0  ;;  %177 = vst.msk [vmem:[#allocation2 + $0x18] sm:$0xff] (!%p471_p5), %vm173_vm0, %v614_v0 }
  0x16 PF: > { %v178_v1 = vld [vmem:[%s163_s18] sm:$0xff]  ;;  %s473_s21 = sshll.u32 %s604_s9, 5  ;;  %v195_v3 = vlaneseq  ;;  %v179_v4 = vld [vmem:[%s163_s18 + $0x8] sm:$0xff]  ;;  %v180_v7 = vld [vmem:[%s163_s18 + $0x10] sm:$0xff]  ;;  %vm253_vm7 = vcmask 261120   ;;  %p482_p6 = scmp.ne.s32.totalorder %s604_s9, 3 }
  0x17   : > { %v472_v2 = vld [vmem:[%s733_s0] ss:$0 sm:$0xff]  ;;  %s194_s22 = ssub.s32 100, %s473_s21  ;;  %v181_v8 = vld [vmem:[%s163_s18 + $0x18] sm:$0xff] }
  0x18   : > { %v189_v5 = vsub.f32 %v178_v1, %v472_v2  ;;  %v190_v6 = vsub.f32 %v179_v4, %v472_v2  ;;  %v662_v9 = vshrl.u32 %v195_v3, 7  ;;  %v200_v10 = vstv %s194_s22  ;;  %v218_v26 = vld [vmem:[#allocation2 + $0x8] sm:$0xff]  ;;  %v217_v27 = vld [vmem:[#allocation2] sm:$0xff] }
  0x19   : > { %v191_v12 = vsub.f32 %v180_v7, %v472_v2  ;;  %v192_v13 = vsub.f32 %v181_v8, %v472_v2  ;;  %v220_v32 = vld [vmem:[#allocation2 + $0x18] sm:$0xff]  ;;  %v219_v33 = vld [vmem:[#allocation2 + $0x10] sm:$0xff]  ;;  %v368_v41 = vand.u32 (!%p482_p6), 127, %v195_v3 }
  0x1a   : > { %v509_v11 = vpack.c.bf16 %v190_v6, %v189_v5  ;;  %vm201_vm1 = vcmp.lt.s32.totalorder %v662_v9, %v200_v10  ;;  %v666_v14 = vadd.s32 8, %v662_v9  ;;  %v669_v15 = vadd.s32 16, %v662_v9 }
  0x1b   : > { %v672_v16 = vadd.s32 24, %v662_v9  ;;  %v213_v17 = vsel %vm201_vm1, %v189_v5, 0.0  ;;  %v515_v18 = vpack.c.bf16 %v192_v13, %v191_v12  ;;  %vm372_vm8 = vcmp.eq.s32.totalorder (!%p482_p6), %v662_v9, %v368_v41 }
  0x1c   : > { %221 = vxpose.xlu0.b32.start [1/4] (short) (narrow) %v213_v17, 32  ;;  %vm202_vm2 = vcmp.lt.s32.totalorder %v666_v14, %v200_v10  ;;  %vm203_vm4 = vcmp.lt.s32.totalorder %v669_v15, %v200_v10  ;;  %vm373_vm9 = vcmp.eq.s32.totalorder (!%p482_p6), %v666_v14, %v368_v41  ;;  %vm374_vm10 = vcmp.eq.s32.totalorder (!%p482_p6), %v669_v15, %v368_v41 }
  0x1d   : > { %v214_v19 = vsel %vm202_vm2, %v190_v6, 0.0  ;;  %vm510_vm3 = vmpackc.low %vm202_vm2, %vm201_vm1  ;;  %vm204_vm5 = vcmp.lt.s32.totalorder %v672_v16, %v200_v10  ;;  %v215_v20 = vsel %vm203_vm4, %v191_v12, 0.0  ;;  %vm375_vm11 = vcmp.eq.s32.totalorder (!%p482_p6), %v672_v16, %v368_v41 }
  0x1e   : > { %vm516_vm6 = vmpackc.low %vm204_vm5, %vm203_vm4  ;;  %511 = vmatprep.subr.msk.bf16.mxu0 %vm510_vm3, %v509_v11  ;;  %521 = vmatprep.subr.msk.bf16.mxu1 %vm510_vm3, %v509_v11  ;;  %v216_v21 = vsel %vm204_vm5, %v192_v13, 0.0  ;;  %vm400_vm12 = vcmp.eq.s32.totalorder (!%p482_p6), %v662_v9, 0  ;;  %vm401_vm13 = vcmp.eq.s32.totalorder (!%p482_p6), %v368_v41, 0 }
  0x1f   : > { %514 = vmatpush3.bf16.msk.msra.mxu0 %vm510_vm3, %v509_v11  ;;  %523 = vmatpush3.bf16.msk.msra.mxu1 %vm510_vm3, %v509_v11  ;;  %vm402_vm14 = vmand (!%p482_p6), %vm400_vm12, %vm401_vm13 }
  0x20   : > { %222 = vxpose.xlu0.b32.cont [2/4] (short) (narrow) %v214_v19, 32  ;;  %517 = vmatprep.subr.msk.bf16.mxu0 %vm516_vm6, %v515_v18 }
  0x21   : > { %522 = vmatprep.subr.msk.bf16.mxu1 %vm516_vm6, %v515_v18 }
  0x23   : > { %520 = vmatpush3.bf16.msk.msra.mxu0 %vm516_vm6, %v515_v18  ;;  %524 = vmatpush3.bf16.msk.msra.mxu1 %vm516_vm6, %v515_v18 }
  0x24   : > { %223 = vxpose.xlu0.b32.cont [3/4] (short) (narrow) %v215_v20, 32 }
  0x28   : > { %224 = vxpose.xlu0.b32.end [4/4] (short) (narrow) %v216_v21, 32 }
  0x9c   : > { %v237_v22 = vpop.trf.xlu0 }
  0x9d   : > { %503 = vmatprep.mubr.msk.f32.mxu0 %vm253_vm7, %v237_v22 }
  0xa0   : > { %v238_v23 = vpop.trf.xlu0 }
  0xa1   : > { %504 = vmatmul.mubr.msk.f32.vlgmr.msra.gmra.mrb[0].mxu0 %vm253_vm7, %v238_v23 }
  0xa4   : > { %v239_v24 = vpop.trf.xlu0 }
  0xa5   : > { %506 = vmatprep.mubr.msk.f32.mxu1 %vm253_vm7, %v239_v24 }
  0xa8   : > { %v240_v25 = vpop.trf.xlu0 }
  0xa9   : > { %507 = vmatmul.mubr.msk.f32.vlgmr.msra.gmra.mrb[0].mxu1 %vm253_vm7, %v240_v25 }
 0x174   : > { %v505_v28 = vpop.f32.mrb[0].mxu0 }
 0x175   : > { %v352_v29 = vadd.f32 %v505_v28, %v218_v26  ;;  %v332_v30 = vpop.f32.mrb[1].mxu0 }
 0x176   : > { %v351_v31 = vadd.f32 %v332_v30, %v217_v27 }
 0x177   : > { %356 = vst.msk [vmem:[#allocation2 + $0x8] sm:$0xff] %vm253_vm7, %v352_v29 }
 0x178   : > { %355 = vst.msk [vmem:[#allocation2] sm:$0xff] %vm253_vm7, %v351_v31 }
 0x17a   : > { %362 = sbr.rel (%p482_p6) target bundleno = 607 (0x25f), region = 36 }
 0x17c   : > { %v508_v34 = vpop.f32.mrb[0].mxu1 }
 0x17d   : > { %v354_v35 = vadd.f32 %v508_v34, %v220_v32  ;;  %v342_v36 = vpop.f32.mrb[1].mxu1 }
 0x17e   : > { %v353_v37 = vadd.f32 %v342_v36, %v219_v33  ;;  %v364_v39 = vld [vmem:[#allocation2 + $0x8] sm:$0xff] (!%p482_p6) }
 0x17f   : > { %358 = vst.msk [vmem:[#allocation2 + $0x18] sm:$0xff] %vm253_vm7, %v354_v35  ;;  %v363_v38 = vld [vmem:[#allocation2] sm:$0xff] (!%p482_p6)  ;;  %v377_v44 = vsel (!%p482_p6), %vm373_vm9, 0.0, %v364_v39 }
 0x180   : > { %357 = vst.msk [vmem:[#allocation2 + $0x10] sm:$0xff] %vm253_vm7, %v353_v37  ;;  %v376_v43 = vsel (!%p482_p6), %vm372_vm8, 0.0, %v363_v38  ;;  %v381_v48 = vmul.f32 (!%p482_p6), %v377_v44, %v377_v44 }
 0x181   : > { %v380_v47 = vmul.f32 %v376_v43, %v376_v43 }
 0x182   : > { %v385_v52 = vsel %vm253_vm7, %v381_v48, 0.0 }
 0x183   : > { %v384_v51 = vsel %vm253_vm7, %v380_v47, 0.0 }
 0x184   : > { %v386_v54 = vadd.f32 %v385_v52, %v384_v51 }
 0x186   : > { %v366_v42 = vld [vmem:[#allocation2 + $0x18] sm:$0xff] }
 0x187   : > { %v365_v40 = vld [vmem:[#allocation2 + $0x10] sm:$0xff]  ;;  %v379_v46 = vsel %vm375_vm11, 0.0, %v366_v42 }
 0x188   : > { %v378_v45 = vsel %vm374_vm10, 0.0, %v365_v40  ;;  %v383_v50 = vmul.f32 %v379_v46, %v379_v46 }
 0x189   : > { %v382_v49 = vmul.f32 %v378_v45, %v378_v45 }
 0x18a   : > { %v389_v55 = vsel %vm253_vm7, %v383_v50, 0.0 }
 0x18b   : > { %v387_v53 = vsel %vm253_vm7, %v382_v49, 0.0 }
 0x18c   : > { %v388_v56 = vadd.f32 %v387_v53, %v386_v54 }
 0x18e   : > { %v390_v57 = vadd.f32 %v389_v55, %v388_v56 }
 0x190   : > { %391 = vadd.xlane.f32.xlu0 %v390_v57 }
 0x21d   : > { %v392_v58 = vpop.xlane.xlu0 %391 }
 0x21e   : > { %v393_v59 = vrot.slane %v392_v58, 4 }
 0x220   : > { %v394_v60 = vadd.f32 %v393_v59, %v392_v58 }
 0x222   : > { %v395_v61 = vrot.slane %v394_v60, 2 }
 0x224   : > { %v396_v62 = vadd.f32 %v395_v61, %v394_v60 }
 0x226   : > { %v397_v63 = vrot.slane %v396_v62, 1 }
 0x228   : > { %v398_v0 = vadd.f32 %v397_v63, %v396_v62 }
 0x22a   : > { %525 = vpush %v398_v0 }
 0x25b   : > { %s526_s23 = spop %525 }
 0x25c   : > { %v403_v1 = vstv %s526_s23 }
 0x25d   : > { %v404_v2 = vsel %vm402_vm14, %v403_v1, 0.0 }
 0x25e   : > { %405 = vst [vmem:[#allocation3] sm:$0xff] %v404_v2 }
 0x25f PF: > { %p698_p7 = scmp.eq.s32.totalorder %s465_s12, 3  ;;  %s615_s25 = smov [#allocation3]  }
 0x260   : > { %s415_s26 = sshll.u32 %s615_s25, 4  ;;  %s416_s26 = int_to_ptr.vmem [resolvable:$true] %s415_s26 }
 0x261   : > { %s560_s27 = scalar_lea.vmem %s416_s26, 128  ;;  %p567_p11 = scmp.lt.s32.totalorder %s416_s26, %s416_s26 }
 0x262   : > { %p561_p8 = scmp.ne.s32.totalorder %s416_s26, %s560_s27  ;;  %p568_p12 = scmp.lt.s32.totalorder %s560_s27, %s560_s27 }
 0x264   : > { %p562_p9 = pnand %p561_p8, %p698_p7  ;;  %p569_p13 = por %p568_p12, %p567_p11 }
 0x266   : > { %p563_p10 = pneg %p562_p9 }
 0x268   : > { %p570_p0 = pnand %p569_p13, %p563_p10 }
 0x26a   : > { %573 = shalt.err (!%p570_p0)
}
 0x26b   : > { %s574_s30 = scalar_lea.hbm %s735_s2, 128 }
 0x26c   : > { %p575_p1 = scmp.ne.s32.totalorder %s735_s2, %s574_s30  ;;  %p580_p4 = scmp.lt.u32.totalorder %s574_s30, %s735_s2 }
 0x26e   : > { %p576_p2 = pnand %p575_p1, %p698_p7 }
 0x270   : > { %p577_p3 = pneg %p576_p2 }
 0x272   : > { %p582_p5 = pnand %p580_p4, %p577_p3 }
 0x274   : > { %585 = shalt.err (!%p582_p5)
}
 0x275   : > { %528 = dma.vmem_to_hbm [thread:$0]  (%p698_p7), %s416_s26, 128, %s735_s2, [#allocation4]  }
 0x276   : > { %599 = dma.done.wait (%p698_p7), [#allocation4], 128  }
 0x277   : > { %601 = vsyncadd (%p698_p7), [#allocation4], 4294967168 }
 0x278 PF: > { %s13_s11 = sadd.s32 1, %s612_s11   ;;  %s737_s9 = smov %s608_s10 }
 0x279   : > { %p10_p6 = scmp.ge.s32.totalorder %s13_s11, 6   ;;  %s738_s10 = smov %s740_s13 }
 0x27b   :  { %12 = sbr.rel (!%p10_p6) target bundleno = 2 (0x2), region = 64 }
 0x282   :  { %428 = vsyncpa [#allocation4], 1 }
 0x283   :  { %430 = vsyncpa [#allocation4 + $0x1], 1 }

</bundles_post_ra>
